<compile_context>
chip_gen: v7x
topology: tpu7x:2x2x1
jax: 0.10.0
libtpu: 0.0.40
codegen_flags: <defaults>
</compile_context>

<pallas_src>
import functools

import jax
import jax.numpy as jnp
from jax.experimental import pallas as pl
from jax.experimental.pallas import tpu as pltpu


def _t5_dense_relu_dense_kernel(x_ref, wi_ref, wo_ref, o_ref, acc_ref):
    k = pl.program_id(1)

    @pl.when(k == 0)
    def _():
        acc_ref[...] = jnp.zeros_like(acc_ref)

    # First matmul: [tm, d_model] @ [d_model, tf] -> [tm, tf] (f32 accumulate).
    h = jnp.dot(x_ref[...], wi_ref[...], preferred_element_type=jnp.float32)
    # ReLU, then cast back to the weight dtype for the second MXU matmul.
    h = jnp.maximum(h, 0.0).astype(wo_ref.dtype)
    # TODO(synk): dropout is identity in eval mode; no stochastic mask emitted.
    # Second matmul: [tm, tf] @ [tf, d_model] accumulated over the d_ff grid axis.
    acc_ref[...] += jnp.dot(h, wo_ref[...], preferred_element_type=jnp.float32)

    @pl.when(k == pl.num_programs(1) - 1)
    def _():
        o_ref[...] = acc_ref[...].astype(o_ref.dtype)


def _pick_tile(total, candidates):
    for c in candidates:
        if c <= total and total % c == 0:
            return c
    return total


def t5_dense_relu_dense(hidden_states, wi_weight, wo_weight, *, tm=None, tf=None):
    """hidden_states: [B, S, d_model]
    wi_weight: [d_ff, d_model]  (torch nn.Linear(d_model, d_ff).weight layout)
    wo_weight: [d_model, d_ff]  (torch nn.Linear(d_ff, d_model).weight layout)
    """
    B, S, d_model = hidden_states.shape
    d_ff = wi_weight.shape[0]
    T = B * S

    # Tile selection: large token tiles so the MXU M-dimension is filled and
    # per-grid-step overhead is amortized; d_ff tiled in multiples of 128 so
    # weights stream/pipeline instead of being fully resident.
    if tm is None:
        tm = _pick_tile(T, (256, 128, 64, 32, 16, 8))
    if tf is None:
        tf = _pick_tile(d_ff, (2048, 1024, 512, 256, 128))
    assert T % tm == 0 and d_ff % tf == 0

    x2d = hidden_states.reshape(T, d_model)
    wi_t = wi_weight.T          # [d_model, d_ff]
    wo_t = wo_weight.T          # [d_ff, d_model]

    out_dtype = hidden_states.dtype
    bytes_accessed = (
        x2d.size * x2d.dtype.itemsize
        + wi_t.size * wi_t.dtype.itemsize
        + wo_t.size * wo_t.dtype.itemsize
        + T * d_model * jnp.dtype(out_dtype).itemsize
    )
    cost = pl.CostEstimate(
        flops=4 * T * d_model * d_ff,        # two matmuls, 2*M*N*K each
        transcendentals=0,
        bytes_accessed=bytes_accessed,
    )

    out2d = pl.pallas_call(
        _t5_dense_relu_dense_kernel,
        out_shape=jax.ShapeDtypeStruct((T, d_model), out_dtype),
        grid_spec=pltpu.PrefetchScalarGridSpec(
            num_scalar_prefetch=0,
            grid=(T // tm, d_ff // tf),
            in_specs=[
                pl.BlockSpec((tm, d_model), lambda i, k: (i, 0)),   # token tile
                pl.BlockSpec((d_model, tf), lambda i, k: (0, k)),   # wi^T slice
                pl.BlockSpec((tf, d_model), lambda i, k: (k, 0)),   # wo^T slice
            ],
            out_specs=pl.BlockSpec((tm, d_model), lambda i, k: (i, 0)),
            scratch_shapes=[pltpu.VMEM((tm, d_model), jnp.float32)],
        ),
        compiler_params=pltpu.CompilerParams(
            dimension_semantics=("parallel", "arbitrary"),
            vmem_limit_bytes=48 * 1024 * 1024,   # safe on v7x (64 MiB), roomy on v5e/v6e
        ),
        cost_estimate=cost,
    )(x2d, wi_t, wo_t)

    return out2d.reshape(B, S, d_model)


def t5_dense_relu_dense_ref(hidden_states, wi_weight, wo_weight):
    """Pure-JAX reference matching the PyTorch module in eval mode."""
    h = hidden_states @ wi_weight.T
    h = jnp.maximum(h, 0.0)
    y = h @ wo_weight.T
    return y.astype(hidden_states.dtype)


if __name__ == "__main__":
    # Small config consistent with T5DenseReluDense: d_model, d_ff
    batch, seq, d_model, d_ff = 2, 8, 32, 64

    key = jax.random.PRNGKey(0)
    k_x, k_wi, k_wo = jax.random.split(key, 3)

    hidden_states = jax.random.normal(k_x, (batch, seq, d_model), jnp.float32)
    # nn.Linear(d_model, d_ff, bias=False).weight -> shape (d_ff, d_model)
    wi_weight = jax.random.normal(k_wi, (d_ff, d_model), jnp.float32) * 0.05
    # nn.Linear(d_ff, d_model, bias=False).weight -> shape (d_model, d_ff)
    wo_weight = jax.random.normal(k_wo, (d_model, d_ff), jnp.float32) * 0.05

    out = t5_dense_relu_dense(hidden_states, wi_weight, wo_weight)
    out = jax.block_until_ready(out)

    ref = t5_dense_relu_dense_ref(hidden_states, wi_weight, wo_weight)
    assert out.shape == hidden_states.shape
    assert jnp.allclose(out, ref, atol=1e-4, rtol=1e-4), "mismatch vs reference"

    print("KERNEL_OK")
</pallas_src>

<mosaic_0001>
module attributes {stable_mosaic.version = 11 : i64} {
  func.func @_t5_dense_relu_dense_kernel(%arg0: i32, %arg1: i32, %arg2: memref<16x32xf32, #tpu.memory_space<vmem>>, %arg3: memref<32x64xf32, #tpu.memory_space<vmem>>, %arg4: memref<64x32xf32, #tpu.memory_space<vmem>>, %arg5: memref<16x32xf32, #tpu.memory_space<vmem>>, %arg6: memref<16x32xf32, #tpu.memory_space<vmem>>) attributes {dimension_semantics = [#tpu.dimension_semantics<parallel>, #tpu.dimension_semantics<arbitrary>], iteration_bounds = array<i64: 1, 1>, scalar_prefetch = 0 : i64, scratch_operands = 1 : i64, tpu.core_type = #tpu.core_type<tc>, window_params = [{transform_indices = @transform_0, window_bounds = array<i64: 16, 32>}, {transform_indices = @transform_1, window_bounds = array<i64: 32, 64>}, {transform_indices = @transform_2, window_bounds = array<i64: 64, 32>}, {transform_indices = @transform_3, window_bounds = array<i64: 16, 32>}]} {
    %c0_i32 = arith.constant 0 : i32
    %0 = arith.cmpi eq, %arg1, %c0_i32 : i32
    %1 = arith.extui %0 : i1 to i32
    %c0_i32_0 = arith.constant 0 : i32
    %2 = arith.cmpi ne, %1, %c0_i32_0 : i32
    scf.if %2 {
      %cst_14 = arith.constant 0.000000e+00 : f32
      %16 = vector.broadcast %cst_14 : f32 to vector<16x32xf32>
      %c0_15 = arith.constant 0 : index
      %c0_16 = arith.constant 0 : index
      %17 = vector.load %arg6[%c0_15, %c0_16] : memref<16x32xf32, #tpu.memory_space<vmem>>, vector<16x32xf32>
      tpu.vector_store %arg6[%c0_15, %c0_16], %16 {strides = array<i32>} : memref<16x32xf32, #tpu.memory_space<vmem>>, vector<16x32xf32>,
    } else {
    }
    %c0 = arith.constant 0 : index
    %c0_1 = arith.constant 0 : index
    %3 = vector.load %arg2[%c0, %c0_1] : memref<16x32xf32, #tpu.memory_space<vmem>>, vector<16x32xf32>
    %c0_2 = arith.constant 0 : index
    %c0_3 = arith.constant 0 : index
    %4 = vector.load %arg3[%c0_2, %c0_3] : memref<32x64xf32, #tpu.memory_space<vmem>>, vector<32x64xf32>
    %cst = arith.constant dense<0.000000e+00> : vector<16x64xf32>
    %5 = tpu.matmul %3, %4, %cst {dimension_numbers = #tpu.dot_dimension_numbers<[1], [0], [0], [1], [0, 0, 1, 1], [], []>} : vector<16x32xf32>, vector<32x64xf32>, vector<16x64xf32> -> vector<16x64xf32>
    %cst_4 = arith.constant 0.000000e+00 : f32
    %6 = vector.broadcast %cst_4 : f32 to vector<16x64xf32>
    %7 = arith.maximumf %5, %6 : vector<16x64xf32>
    %c0_5 = arith.constant 0 : index
    %c0_6 = arith.constant 0 : index
    %8 = vector.load %arg6[%c0_5, %c0_6] : memref<16x32xf32, #tpu.memory_space<vmem>>, vector<16x32xf32>
    %c0_7 = arith.constant 0 : index
    %c0_8 = arith.constant 0 : index
    %9 = vector.load %arg4[%c0_7, %c0_8] : memref<64x32xf32, #tpu.memory_space<vmem>>, vector<64x32xf32>
    %cst_9 = arith.constant dense<0.000000e+00> : vector<16x32xf32>
    %10 = tpu.matmul %7, %9, %cst_9 {dimension_numbers = #tpu.dot_dimension_numbers<[1], [0], [0], [1], [0, 0, 1, 1], [], []>} : vector<16x64xf32>, vector<64x32xf32>, vector<16x32xf32> -> vector<16x32xf32>
    %11 = arith.addf %8, %10 : vector<16x32xf32>
    %c0_10 = arith.constant 0 : index
    %c0_11 = arith.constant 0 : index
    %12 = vector.load %arg6[%c0_10, %c0_11] : memref<16x32xf32, #tpu.memory_space<vmem>>, vector<16x32xf32>
    tpu.vector_store %arg6[%c0_10, %c0_11], %11 {strides = array<i32>} : memref<16x32xf32, #tpu.memory_space<vmem>>, vector<16x32xf32>,
    %c0_i32_12 = arith.constant 0 : i32
    %13 = arith.cmpi eq, %arg1, %c0_i32_12 : i32
    %14 = arith.extui %13 : i1 to i32
    %c0_i32_13 = arith.constant 0 : i32
    %15 = arith.cmpi ne, %14, %c0_i32_13 : i32
    scf.if %15 {
      %c0_14 = arith.constant 0 : index
      %c0_15 = arith.constant 0 : index
      %16 = vector.load %arg6[%c0_14, %c0_15] : memref<16x32xf32, #tpu.memory_space<vmem>>, vector<16x32xf32>
      %c0_16 = arith.constant 0 : index
      %c0_17 = arith.constant 0 : index
      %17 = vector.load %arg5[%c0_16, %c0_17] : memref<16x32xf32, #tpu.memory_space<vmem>>, vector<16x32xf32>
      tpu.vector_store %arg5[%c0_16, %c0_17], %16 {strides = array<i32>} : memref<16x32xf32, #tpu.memory_space<vmem>>, vector<16x32xf32>,
    } else {
    }
    return
  }
  func.func @transform_0(%arg0: i32, %arg1: i32) -> (i32, i32) {
    %c0_i32 = arith.constant 0 : i32
    %c0_i32_0 = arith.constant 0 : i32
    return %arg0, %c0_i32 : i32, i32
  }
  func.func @transform_1(%arg0: i32, %arg1: i32) -> (i32, i32) {
    %c0_i32 = arith.constant 0 : i32
    %c0_i32_0 = arith.constant 0 : i32
    return %c0_i32, %arg1 : i32, i32
  }
  func.func @transform_2(%arg0: i32, %arg1: i32) -> (i32, i32) {
    %c0_i32 = arith.constant 0 : i32
    %c0_i32_0 = arith.constant 0 : i32
    return %arg1, %c0_i32 : i32, i32
  }
  func.func @transform_3(%arg0: i32, %arg1: i32) -> (i32, i32) {
    %c0_i32 = arith.constant 0 : i32
    %c0_i32_0 = arith.constant 0 : i32
    return %arg0, %c0_i32 : i32, i32
  }
}

</mosaic_0001>

<bundles_post_ra>
// kernel: tpu_custom_call.1
= control target key start
LH: loop header
LB: loop body
LE: loop exit
PB: predicated region body
PF: predicated region fallthrough
CT: control target
= control target key end

     0   :  { %vm19_vm0 = vcmask 261120   ;;  %s419_s0 = inlined_call_operand.vmem [shape: f32[16,32], index: 0, kind: input, shape index: {}]   ;;  %s420_s1 = inlined_call_operand.vmem [shape: f32[32,64], index: 1, kind: input, shape index: {}]   ;;  %s421_s2 = inlined_call_operand.vmem [shape: f32[64,32], index: 2, kind: input, shape index: {}]   ;;  %s422_s3 = inlined_call_operand.hbm [shape: f32[16,32], index: 3, kind: output, shape index: {}]  }
   0x1   :  { %v24_v0 = vld [vmem:[%s420_s1] sm:$0xff]  ;;  %v25_v1 = vld [vmem:[%s420_s1 + $0x8] sm:$0xff]  ;;  %v26_v2 = vld [vmem:[%s420_s1 + $0x10] sm:$0xff] }
   0x2   :  { %v281_v3 = vpack.c.bf16 %v25_v1, %v24_v0  ;;  %v27_v4 = vld [vmem:[%s420_s1 + $0x18] sm:$0xff]  ;;  %v22_v5 = vld [vmem:[%s419_s0] sm:$0xff]  ;;  %v115_v8 = vld [vmem:[%s421_s2 + $0x8] sm:$0xff] }
   0x3   :  { %v285_v6 = vpack.c.bf16 %v27_v4, %v26_v2  ;;  %259 = vmatprep.mubr.msk.f32.mxu0 %vm19_vm0, %v22_v5  ;;  %v114_v7 = vld [vmem:[%s421_s2] sm:$0xff]  ;;  %v116_v9 = vld [vmem:[%s421_s2 + $0x10] sm:$0xff]  ;;  %v117_v11 = vld [vmem:[%s421_s2 + $0x18] sm:$0xff] }
   0x4   :  { %282 = vmatprep.subr.bf16.mxu0 %v281_v3  ;;  %v289_v10 = vpack.c.bf16 %v115_v8, %v114_v7  ;;  %v293_v12 = vpack.c.bf16 %v117_v11, %v116_v9  ;;  %v118_v13 = vld [vmem:[%s421_s2 + $0x20] sm:$0xff]  ;;  %v119_v14 = vld [vmem:[%s421_s2 + $0x28] sm:$0xff] }
   0x5   :  { %284 = vmatpush3.bf16.msra.mxu0 %v281_v3 }
   0x6   :  { %8 = vsyncpa [#allocation4], 0  ;;  %286 = vmatprep.subr.bf16.mxu0 %v285_v6  ;;  %290 = vmatprep.subr.bf16.mxu1 %v289_v10  ;;  %v297_v15 = vpack.c.bf16 %v119_v14, %v118_v13  ;;  %v23_v16 = vld [vmem:[%s419_s0 + $0x8] sm:$0xff]  ;;  %v120_v17 = vld [vmem:[%s421_s2 + $0x30] sm:$0xff]  ;;  %v333_v20 = vmov 0.0   ;;  %vm122_vm1 = vcmask 523264  }
   0x7   :  { %292 = vmatpush3.bf16.msra.mxu1 %v289_v10  ;;  %v121_v18 = vld [vmem:[%s421_s2 + $0x38] sm:$0xff]  ;;  %21 = vst.msk [vmem:[#allocation2 + $0x8] sm:$0xff] %vm19_vm0, %v333_v20  ;;  %20 = vst.msk [vmem:[#allocation2] sm:$0xff] %vm19_vm0, %v333_v20  ;;  %s334_s0 = smov [#allocation3]  }
   0x8   :  { %294 = vmatprep.subr.bf16.mxu1 %v293_v12  ;;  %v301_v19 = vpack.c.bf16 %v121_v18, %v120_v17  ;;  %s220_s2 = sshll.u32 %s334_s0, 4  ;;  %s221_s2 = int_to_ptr.vmem [resolvable:$true] %s220_s2 }
   0x9   :  { %288 = vmatpush3.bf16.msra.mxu0 %v285_v6  ;;  %s309_s12 = scalar_lea.vmem %s221_s2, 256  ;;  %p314_p1 = scmp.lt.s32.totalorder %s221_s2, %s221_s2 }
   0xa   :  { %p310_p0 = scmp.ne.s32.totalorder %s221_s2, %s309_s12  ;;  %p315_p2 = scmp.lt.s32.totalorder %s309_s12, %s309_s12 }
   0xb   :  { %296 = vmatpush3.bf16.msra.mxu1 %v293_v12 }
   0xc   :  { %260 = vmatmul.mubr.msk.f32.vlgmr.msra.gmra.mrb[0].mxu0 %vm19_vm0, %v23_v16  ;;  %298 = vmatprep.subr.bf16.mxu1 %v297_v15  ;;  %p316_p3 = por %p315_p2, %p314_p1 }
   0xe   :  { %v113_v25 = vld [vmem:[#allocation2 + $0x8] sm:$0xff]  ;;  %v112_v26 = vld [vmem:[#allocation2] sm:$0xff]  ;;  %p317_p4 = pnand %p316_p3, %p310_p0 }
   0xf   :  { %300 = vmatpush3.bf16.msra.mxu1 %v297_v15 }
  0x10   :  { %302 = vmatprep.subr.bf16.mxu1 %v301_v19 }
  0x13   :  { %304 = vmatpush3.bf16.msra.mxu1 %v301_v19 }
  0xdf   :  { %v261_v21 = vpop.f32.mrb[0].mxu0 }
  0xe0   :  { %v101_v22 = vpop.f32.mrb[1].mxu0  ;;  %v111_v24 = vmax.f32 %v261_v21, 0.0 }
  0xe1   :  { %v110_v23 = vmax.f32 %v101_v22, 0.0 }
  0xe3   :  { %278 = vmatprep.mubr.msk.f32.mxu1 %vm122_vm1, %v110_v23 }
  0xe4   :  { %279 = vmatmul.mubr.msk.f32.vlgmr.msra.gmra.mrb[0].mxu1 %vm122_vm1, %v111_v24 }
 0x1b7   :  { %v280_v27 = vpop.f32.mrb[0].mxu1 }
 0x1b8   :  { %v205_v28 = vadd.f32 %v280_v27, %v113_v25  ;;  %v195_v29 = vpop.f32.mrb[1].mxu1 }
 0x1b9   :  { %v204_v30 = vadd.f32 %v195_v29, %v112_v26 }
 0x1ba   :  { %207 = vst.msk [vmem:[#allocation2 + $0x8] sm:$0xff] %vm19_vm0, %v205_v28 }
 0x1bb   :  { %206 = vst.msk [vmem:[#allocation2] sm:$0xff] %vm19_vm0, %v204_v30 }
 0x1c1   :  { %v212_v31 = vld [vmem:[#allocation2 + $0x8] sm:$0xff] }
 0x1c2   :  { %v211_v32 = vld [vmem:[#allocation2] sm:$0xff]  ;;  %214 = vst.msk [vmem:[#allocation3 + $0x8] sm:$0xff] %vm19_vm0, %v212_v31 }
 0x1c3   :  { %213 = vst.msk [vmem:[#allocation3] sm:$0xff] %vm19_vm0, %v211_v32 }
 0x1c4   :  { %320 = shalt.err (!%p317_p4)
}
 0x1c5   :  { %s321_s15 = scalar_lea.hbm %s422_s3, 256 }
 0x1c6   :  { %p322_p5 = scmp.ne.s32.totalorder %s422_s3, %s321_s15  ;;  %p325_p6 = scmp.lt.u32.totalorder %s321_s15, %s422_s3 }
 0x1c8   :  { %p327_p7 = pnand %p325_p6, %p322_p5 }
 0x1ca   :  { %330 = shalt.err (!%p327_p7)
}
 0x1cb   :  { %s335_s20 = smov 128   ;;  %s336_s21 = smov 8  }
 0x1cc   :  { %226 = dma.vmem_to_hbm [thread:$0]  %s221_s2, 256, %s422_s3, [#allocation4], %s335_s20, %s335_s20, %s336_s21  }
 0x1cd   :  { %331 = dma.done.wait [#allocation4], 256  }
 0x1ce   :  { %332 = vsyncadd [#allocation4], 4294967040 }
 0x1cf   :  { %230 = vsyncpa [#allocation4], 1 }

</bundles_post_ra>
